<compile_context>
chip_gen: v5e
topology: v5e:2x2
jax: 0.10.0
libtpu: 0.0.40
codegen_flags: <defaults>
</compile_context>

<pallas_src>
import functools

import jax
import jax.numpy as jnp
from jax.experimental import pallas as pl
from jax.experimental.pallas import tpu as pltpu


def _block_kernel(h_ref, *rest, eps, has_residual, tn):
    if has_residual:
        (r_ref, gamma_ref, beta_ref, w_ref, bias_ref,
         out_ref, res_ref, normed_ref) = rest
    else:
        (gamma_ref, beta_ref, w_ref, bias_ref,
         out_ref, res_ref, normed_ref) = rest
        r_ref = None

    j = pl.program_id(1)

    # ---- fused add + LayerNorm, computed ONCE per row tile (j == 0) --------
    # TODO(synk): hide this LN bubble by splitting the row tile into 2-4
    # sub-chunks (lax.fori_loop(unroll=True)) so the first MXU matmul overlaps
    # the LN of the next sub-chunk.
    @pl.when(j == 0)
    def _():
        h = h_ref[...].astype(jnp.float32)
        res = h if r_ref is None else r_ref[...].astype(jnp.float32) + h
        d = res.shape[-1]
        inv_d = jnp.float32(1.0 / d)
        mean = jnp.sum(res, axis=-1, keepdims=True) * inv_d
        cen = res - mean
        # centered two-pass variance (numerically stable for large-mean
        # residual streams; matches the PyTorch LayerNorm reference)
        var = jnp.sum(cen * cen, axis=-1, keepdims=True) * inv_d
        normed = cen * jax.lax.rsqrt(var + jnp.float32(eps))
        normed = normed * gamma_ref[...] + beta_ref[...]
        normed_ref[...] = normed.astype(normed_ref.dtype)

    # ---- fp32 residual output, tiled over j (small resident VMEM) ----------
    d_full = h_ref.shape[1]
    if tn == d_full:
        h_slab = h_ref[...].astype(jnp.float32)
        if r_ref is None:
            res_slab = h_slab
        else:
            res_slab = r_ref[...].astype(jnp.float32) + h_slab
    else:
        col = j * tn
        if tn % 128 == 0:
            col = pl.multiple_of(col, 128)
        h_slab = h_ref[:, pl.ds(col, tn)].astype(jnp.float32)
        if r_ref is None:
            res_slab = h_slab
        else:
            res_slab = r_ref[:, pl.ds(col, tn)].astype(jnp.float32) + h_slab
    res_ref[...] = res_slab

    # ---- mixer: Linear(dim, dim) column tile on the MXU (fp32 accumulate) --
    acc = jnp.dot(normed_ref[...], w_ref[...], preferred_element_type=jnp.float32)
    out_ref[...] = (acc + bias_ref[...]).astype(out_ref.dtype)


def _vmem_capacity_bytes():
    try:
        info = pltpu.get_tpu_info()
        cap = getattr(info, "vmem_capacity_bytes", None)
        if cap:
            return int(cap)
    except Exception:
        pass
    return 64 << 20  # conservative fallback (v7x per-TensorCore VMEM)


def _round_up(x, m):
    return ((x + m - 1) // m) * m


def block_forward(hidden_states, residual, gamma, beta, w_mix, b_mix,
                  eps=1e-5, tm=1024, tn=512, mxu_dtype=None):
    """Pallas Block.forward. Returns (mixer(LN(residual+h)), residual_fp32)."""
    B, L, D = hidden_states.shape
    M = B * L
    out_dtype = hidden_states.dtype
    has_residual = residual is not None

    # MXU feed dtype: bf16 by default (fp32 accumulate) unless the caller
    # explicitly requests fp32 weights or the weights are already narrower.
    if mxu_dtype is None:
        mxu_dtype = jnp.bfloat16 if w_mix.dtype == jnp.float32 else w_mix.dtype
    mxu_dtype = jnp.dtype(mxu_dtype)

    # -------- column tile (weight output columns per grid step) -------------
    TN = D if D <= tn else tn
    if TN < D:
        TN = max(128, (TN // 128) * 128)
        while TN > 128 and D % TN != 0:
            TN -= 128
        if D % TN != 0:
            TN = D

    # -------- row tile: the arithmetic-intensity lever -----------------------
    TM = min(tm, M)
    if TM < M:
        TM = max(8, (TM // 8) * 8)
    # guarantee >= 2 steps on the "parallel" row axis (v7x dual-TensorCore)
    if M >= 16 and pl.cdiv(M, TM) < 2:
        half = _round_up((M + 1) // 2, 8)
        if half < M:
            TM = half

    isz = lambda dt: jnp.dtype(dt).itemsize
    h_item = isz(hidden_states.dtype)
    r_item = isz(residual.dtype) if has_residual else 0
    w_item = isz(mxu_dtype)
    o_item = isz(out_dtype)

    def vmem_need(tm_):
        n = 2 * tm_ * D * h_item                   # hidden in (double-buffered)
        if has_residual:
            n += 2 * tm_ * D * r_item              # residual in
        n += 2 * tm_ * TN * o_item                 # hidden out
        n += 2 * tm_ * TN * 4                      # residual out (fp32, j-tiled)
        n += 2 * D * TN * w_item                   # weight column tile
        n += 2 * TN * 4 + 4 * D * 4                # bias / gamma / beta
        n += tm_ * D * w_item                      # normed scratch
        return n

    vmem_cap = int(_vmem_capacity_bytes() * 0.85)  # leave Mosaic headroom
    while TM > 8 and vmem_need(TM) > vmem_cap:
        new_tm = max(8, _round_up(TM // 2, 8))
        if new_tm >= TM:
            break
        TM = new_tm

    grid = (pl.cdiv(M, TM), pl.cdiv(D, TN))
    vmem_limit = min(vmem_cap,
                     max(int(vmem_need(TM) * 1.3) + (4 << 20), 32 << 20))

    h2 = hidden_states.reshape(M, D)
    gamma2 = gamma.reshape(1, D).astype(jnp.float32)
    beta2 = beta.reshape(1, D).astype(jnp.float32)
    bias2 = b_mix.reshape(1, D).astype(jnp.float32)
    w_c = w_mix.astype(mxu_dtype)

    in_specs = [pl.BlockSpec((TM, D), lambda i, j: (i, 0))]          # hidden
    operands = [h2]
    if has_residual:
        in_specs.append(pl.BlockSpec((TM, D), lambda i, j: (i, 0)))  # residual
        operands.append(residual.reshape(M, D))
    in_specs += [
        pl.BlockSpec((1, D), lambda i, j: (0, 0)),      # gamma (resident)
        pl.BlockSpec((1, D), lambda i, j: (0, 0)),      # beta  (resident)
        # TODO(synk): on v5e add pipeline_mode=pl.Buffered(3) on the weight
        # spec if weight DMA is still exposed at moderate TM.
        pl.BlockSpec((D, TN), lambda i, j: (0, j)),     # weight (column tiled)
        pl.BlockSpec((1, TN), lambda i, j: (0, j)),     # bias
    ]
    operands += [gamma2, beta2, w_c, bias2]

    out_specs = [
        pl.BlockSpec((TM, TN), lambda i, j: (i, j)),    # hidden out
        pl.BlockSpec((TM, TN), lambda i, j: (i, j)),    # residual out (fp32)
    ]
    out_shape = (
        jax.ShapeDtypeStruct((M, D), out_dtype),
        jax.ShapeDtypeStruct((M, D), jnp.float32),
    )

    kernel = functools.partial(_block_kernel, eps=float(eps),
                               has_residual=has_residual, tn=TN)

    out, res = pl.pallas_call(
        kernel,
        out_shape=out_shape,
        grid=grid,
        in_specs=in_specs,
        out_specs=out_specs,
        scratch_shapes=[pltpu.VMEM((TM, D), mxu_dtype)],
        compiler_params=pltpu.CompilerParams(
            dimension_semantics=("parallel", "arbitrary"),
            vmem_limit_bytes=vmem_limit,
        ),
    )(*operands)

    return out.reshape(B, L, D), res.reshape(B, L, D)


def _reference(hidden_states, residual, gamma, beta, w_mix, b_mix,
               eps=1e-5, compute_dtype=None):
    """Plain-JAX reference mirroring the PyTorch forward (unfused path)."""
    if compute_dtype is None:
        compute_dtype = w_mix.dtype
    h = hidden_states.astype(jnp.float32)
    res = h if residual is None else residual.astype(jnp.float32) + h
    mean = jnp.mean(res, axis=-1, keepdims=True)
    var = jnp.mean((res - mean) ** 2, axis=-1, keepdims=True)
    normed = (res - mean) * jax.lax.rsqrt(var + eps)
    normed = normed * gamma.astype(jnp.float32) + beta.astype(jnp.float32)
    normed = normed.astype(compute_dtype)
    out = (jnp.einsum("bld,de->ble", normed, w_mix.astype(compute_dtype),
                      preferred_element_type=jnp.float32)
           + b_mix.astype(jnp.float32)).astype(hidden_states.dtype)
    return out, res


if __name__ == "__main__":
    key = jax.random.PRNGKey(0)
    k_h, k_r, k_g, k_b, k_w, k_bb = jax.random.split(key, 6)

    # ------------- test 1: small fp32, exact fp32 MXU path, both residuals ---
    B, L, D = 2, 8, 32
    hidden = jax.random.normal(k_h, (B, L, D), dtype=jnp.float32)
    resid = jax.random.normal(k_r, (B, L, D), dtype=jnp.float32)
    gamma = 1.0 + 0.01 * jax.random.normal(k_g, (D,), dtype=jnp.float32)
    beta = 0.01 * jax.random.normal(k_b, (D,), dtype=jnp.float32)
    w_mix = jax.random.normal(k_w, (D, D), dtype=jnp.float32) / jnp.sqrt(D)
    b_mix = 0.01 * jax.random.normal(k_bb, (D,), dtype=jnp.float32)

    out0, res0 = block_forward(hidden, None, gamma, beta, w_mix, b_mix,
                               mxu_dtype=jnp.float32)
    out1, res1 = block_forward(hidden, resid, gamma, beta, w_mix, b_mix,
                               mxu_dtype=jnp.float32)
    jax.block_until_ready((out0, res0, out1, res1))
    r_out0, r_res0 = _reference(hidden, None, gamma, beta, w_mix, b_mix,
                                compute_dtype=jnp.float32)
    r_out1, r_res1 = _reference(hidden, resid, gamma, beta, w_mix, b_mix,
                                compute_dtype=jnp.float32)
    assert jnp.allclose(out0, r_out0, atol=1e-3, rtol=1e-3)
    assert jnp.allclose(res0, r_res0, atol=1e-5, rtol=1e-5)
    assert jnp.allclose(out1, r_out1, atol=1e-3, rtol=1e-3)
    assert jnp.allclose(res1, r_res1, atol=1e-5, rtol=1e-5)

    # ------------- test 1b: default path (fp32 weights fed to MXU as bf16) ---
    out1b, res1b = block_forward(hidden, resid, gamma, beta, w_mix, b_mix)
    jax.block_until_ready((out1b, res1b))
    r_out1b, r_res1b = _reference(hidden, resid, gamma, beta, w_mix, b_mix,
                                  compute_dtype=jnp.bfloat16)
    assert jnp.allclose(out1b, r_out1b, atol=2e-2, rtol=2e-2)
    assert jnp.allclose(res1b, r_res1b, atol=1e-5, rtol=1e-5)

    # ------------- test 2: multi-tile grid (2 row tiles x 2 column tiles) ----
    B2, L2, D2 = 2, 192, 256
    k2 = jax.random.split(jax.random.PRNGKey(1), 6)
    hidden2 = jax.random.normal(k2[0], (B2, L2, D2), dtype=jnp.float32)
    resid2 = jax.random.normal(k2[1], (B2, L2, D2), dtype=jnp.float32)
    gamma2 = 1.0 + 0.01 * jax.random.normal(k2[2], (D2,), dtype=jnp.float32)
    beta2 = 0.01 * jax.random.normal(k2[3], (D2,), dtype=jnp.float32)
    w2 = jax.random.normal(k2[4], (D2, D2), dtype=jnp.float32) / jnp.sqrt(D2)
    b2 = 0.01 * jax.random.normal(k2[5], (D2,), dtype=jnp.float32)

    out2, res2 = block_forward(hidden2, resid2, gamma2, beta2, w2, b2,
                               tm=1024, tn=128, mxu_dtype=jnp.float32)
    jax.block_until_ready((out2, res2))
    r_out2, r_res2 = _reference(hidden2, resid2, gamma2, beta2, w2, b2,
                                compute_dtype=jnp.float32)
    assert jnp.allclose(out2, r_out2, atol=1e-3, rtol=1e-3)
    assert jnp.allclose(res2, r_res2, atol=1e-5, rtol=1e-5)

    # ------------- test 3: bf16 model dtype, bf16 MXU feed -------------------
    hidden_bf = hidden.astype(jnp.bfloat16)
    w_bf = w_mix.astype(jnp.bfloat16)
    out3, res3 = block_forward(hidden_bf, resid, gamma, beta, w_bf, b_mix)
    jax.block_until_ready((out3, res3))
    r_out3, r_res3 = _reference(hidden_bf, resid, gamma, beta, w_bf, b_mix)
    assert out3.dtype == jnp.bfloat16 and res3.dtype == jnp.float32
    assert jnp.allclose(out3.astype(jnp.float32), r_out3.astype(jnp.float32),
                        atol=5e-2, rtol=5e-2)
    assert jnp.allclose(res3, r_res3, atol=1e-5, rtol=1e-5)

    print("KERNEL_OK")
</pallas_src>

<mosaic_0001>
module attributes {stable_mosaic.version = 11 : i64} {
  func.func @_block_kernel(%arg0: i32, %arg1: i32, %arg2: memref<8x32xf32, #tpu.memory_space<vmem>>, %arg3: memref<1x32xf32, #tpu.memory_space<vmem>>, %arg4: memref<1x32xf32, #tpu.memory_space<vmem>>, %arg5: memref<32x32xf32, #tpu.memory_space<vmem>>, %arg6: memref<1x32xf32, #tpu.memory_space<vmem>>, %arg7: memref<8x32xf32, #tpu.memory_space<vmem>>, %arg8: memref<8x32xf32, #tpu.memory_space<vmem>>, %arg9: memref<8x32xf32, #tpu.memory_space<vmem>>) attributes {dimension_semantics = [#tpu.dimension_semantics<parallel>, #tpu.dimension_semantics<arbitrary>], iteration_bounds = array<i64: 2, 1>, scalar_prefetch = 0 : i64, scratch_operands = 1 : i64, tpu.core_type = #tpu.core_type<tc>, window_params = [{transform_indices = @transform_0, window_bounds = array<i64: 8, 32>}, {pipeline_mode = #tpu.pipeline_mode<synchronous>, transform_indices = @transform_1, window_bounds = array<i64: 1, 32>}, {pipeline_mode = #tpu.pipeline_mode<synchronous>, transform_indices = @transform_2, window_bounds = array<i64: 1, 32>}, {transform_indices = @transform_3, window_bounds = array<i64: 32, 32>}, {transform_indices = @transform_4, window_bounds = array<i64: 1, 32>}, {transform_indices = @transform_5, window_bounds = array<i64: 8, 32>}, {transform_indices = @transform_6, window_bounds = array<i64: 8, 32>}]} {
    %c0_i32 = arith.constant 0 : i32
    %0 = arith.cmpi eq, %arg1, %c0_i32 : i32
    %1 = arith.extui %0 : i1 to i32
    %c0_i32_0 = arith.constant 0 : i32
    %2 = arith.cmpi ne, %1, %c0_i32_0 : i32
    scf.if %2 {
      %c0_12 = arith.constant 0 : index
      %c0_13 = arith.constant 0 : index
      %12 = vector.load %arg2[%c0_12, %c0_13] : memref<8x32xf32, #tpu.memory_space<vmem>>, vector<8x32xf32>
      %cst_14 = arith.constant dense<0.000000e+00> : vector<8xf32>
      %13 = vector.multi_reduction <add>, %12, %cst_14 [1] : vector<8x32xf32> to vector<8xf32>
      %14 = vector.shape_cast %13 : vector<8xf32> to vector<8x1xf32>
      %cst_15 = arith.constant 3.125000e-02 : f32
      %15 = vector.broadcast %cst_15 : f32 to vector<8x1xf32>
      %16 = arith.mulf %14, %15 : vector<8x1xf32>
      %17 = vector.broadcast %16 : vector<8x1xf32> to vector<8x32xf32>
      %18 = arith.subf %12, %17 : vector<8x32xf32>
      %19 = arith.mulf %18, %18 : vector<8x32xf32>
      %cst_16 = arith.constant dense<0.000000e+00> : vector<8xf32>
      %20 = vector.multi_reduction <add>, %19, %cst_16 [1] : vector<8x32xf32> to vector<8xf32>
      %21 = vector.shape_cast %20 : vector<8xf32> to vector<8x1xf32>
      %cst_17 = arith.constant 3.125000e-02 : f32
      %22 = vector.broadcast %cst_17 : f32 to vector<8x1xf32>
      %23 = arith.mulf %21, %22 : vector<8x1xf32>
      %cst_18 = arith.constant 9.99999974E-6 : f32
      %24 = vector.broadcast %cst_18 : f32 to vector<8x1xf32>
      %25 = arith.addf %23, %24 : vector<8x1xf32>
      %26 = math.rsqrt %25 : vector<8x1xf32>
      %27 = vector.broadcast %26 : vector<8x1xf32> to vector<8x32xf32>
      %28 = arith.mulf %18, %27 : vector<8x32xf32>
      %c0_19 = arith.constant 0 : index
      %c0_20 = arith.constant 0 : index
      %29 = vector.load %arg3[%c0_19, %c0_20] : memref<1x32xf32, #tpu.memory_space<vmem>>, vector<1x32xf32>
      %30 = vector.broadcast %29 : vector<1x32xf32> to vector<8x32xf32>
      %31 = arith.mulf %28, %30 : vector<8x32xf32>
      %c0_21 = arith.constant 0 : index
      %c0_22 = arith.constant 0 : index
      %32 = vector.load %arg4[%c0_21, %c0_22] : memref<1x32xf32, #tpu.memory_space<vmem>>, vector<1x32xf32>
      %33 = vector.broadcast %32 : vector<1x32xf32> to vector<8x32xf32>
      %34 = arith.addf %31, %33 : vector<8x32xf32>
      %c0_23 = arith.constant 0 : index
      %c0_24 = arith.constant 0 : index
      %35 = vector.load %arg9[%c0_23, %c0_24] : memref<8x32xf32, #tpu.memory_space<vmem>>, vector<8x32xf32>
      tpu.vector_store %arg9[%c0_23, %c0_24], %34 {strides = array<i32>} : memref<8x32xf32, #tpu.memory_space<vmem>>, vector<8x32xf32>,
    } else {
    }
    %c0 = arith.constant 0 : index
    %c0_1 = arith.constant 0 : index
    %3 = vector.load %arg2[%c0, %c0_1] : memref<8x32xf32, #tpu.memory_space<vmem>>, vector<8x32xf32>
    %c0_2 = arith.constant 0 : index
    %c0_3 = arith.constant 0 : index
    %4 = vector.load %arg8[%c0_2, %c0_3] : memref<8x32xf32, #tpu.memory_space<vmem>>, vector<8x32xf32>
    tpu.vector_store %arg8[%c0_2, %c0_3], %3 {strides = array<i32>} : memref<8x32xf32, #tpu.memory_space<vmem>>, vector<8x32xf32>,
    %c0_4 = arith.constant 0 : index
    %c0_5 = arith.constant 0 : index
    %5 = vector.load %arg9[%c0_4, %c0_5] : memref<8x32xf32, #tpu.memory_space<vmem>>, vector<8x32xf32>
    %c0_6 = arith.constant 0 : index
    %c0_7 = arith.constant 0 : index
    %6 = vector.load %arg5[%c0_6, %c0_7] : memref<32x32xf32, #tpu.memory_space<vmem>>, vector<32x32xf32>
    %cst = arith.constant dense<0.000000e+00> : vector<8x32xf32>
    %7 = tpu.matmul %5, %6, %cst {dimension_numbers = #tpu.dot_dimension_numbers<[1], [0], [0], [1], [0, 0, 1, 1], [], []>} : vector<8x32xf32>, vector<32x32xf32>, vector<8x32xf32> -> vector<8x32xf32>
    %c0_8 = arith.constant 0 : index
    %c0_9 = arith.constant 0 : index
    %8 = vector.load %arg6[%c0_8, %c0_9] : memref<1x32xf32, #tpu.memory_space<vmem>>, vector<1x32xf32>
    %9 = vector.broadcast %8 : vector<1x32xf32> to vector<8x32xf32>
    %10 = arith.addf %7, %9 : vector<8x32xf32>
    %c0_10 = arith.constant 0 : index
    %c0_11 = arith.constant 0 : index
    %11 = vector.load %arg7[%c0_10, %c0_11] : memref<8x32xf32, #tpu.memory_space<vmem>>, vector<8x32xf32>
    tpu.vector_store %arg7[%c0_10, %c0_11], %10 {strides = array<i32>} : memref<8x32xf32, #tpu.memory_space<vmem>>, vector<8x32xf32>,
    return
  }
  func.func @transform_0(%arg0: i32, %arg1: i32) -> (i32, i32) {
    %c0_i32 = arith.constant 0 : i32
    %c0_i32_0 = arith.constant 0 : i32
    return %arg0, %c0_i32 : i32, i32
  }
  func.func @transform_1(%arg0: i32, %arg1: i32) -> (i32, i32) {
    %c0_i32 = arith.constant 0 : i32
    %c0_i32_0 = arith.constant 0 : i32
    %c0_i32_1 = arith.constant 0 : i32
    return %c0_i32, %c0_i32_0 : i32, i32
  }
  func.func @transform_2(%arg0: i32, %arg1: i32) -> (i32, i32) {
    %c0_i32 = arith.constant 0 : i32
    %c0_i32_0 = arith.constant 0 : i32
    %c0_i32_1 = arith.constant 0 : i32
    return %c0_i32, %c0_i32_0 : i32, i32
  }
  func.func @transform_3(%arg0: i32, %arg1: i32) -> (i32, i32) {
    %c0_i32 = arith.constant 0 : i32
    %c0_i32_0 = arith.constant 0 : i32
    return %c0_i32, %arg1 : i32, i32
  }
  func.func @transform_4(%arg0: i32, %arg1: i32) -> (i32, i32) {
    %c0_i32 = arith.constant 0 : i32
    %c0_i32_0 = arith.constant 0 : i32
    return %c0_i32, %arg1 : i32, i32
  }
  func.func @transform_5(%arg0: i32, %arg1: i32) -> (i32, i32) {
    %c0_i32 = arith.constant 0 : i32
    return %arg0, %arg1 : i32, i32
  }
  func.func @transform_6(%arg0: i32, %arg1: i32) -> (i32, i32) {
    %c0_i32 = arith.constant 0 : i32
    return %arg0, %arg1 : i32, i32
  }
}

</mosaic_0001>

<bundles_post_ra>
// kernel: tpu_custom_call.1
= control target key start
LH: loop header
LB: loop body
LE: loop exit
PB: predicated region body
PF: predicated region fallthrough
CT: control target
= control target key end

     0   :  { %s1149_s0 = inlined_call_operand.hbm [shape: f32[16,32], index: 0, kind: input, shape index: {}]   ;;  %s1150_s1 = inlined_call_operand.hbm [shape: f32[1,32], index: 1, kind: input, shape index: {}]   ;;  %s1151_s2 = inlined_call_operand.vmem [shape: f32[1,32], index: 2, kind: input, shape index: {}]   ;;  %s1152_s3 = inlined_call_operand.hbm [shape: f32[32,32], index: 3, kind: input, shape index: {}]   ;;  %s1153_s4 = inlined_call_operand.vmem [shape: f32[1,32], index: 4, kind: input, shape index: {}]   ;;  %s1154_s5 = inlined_call_operand.hbm [shape: f32[16,32], index: 5, kind: output, shape index: {0}]   ;;  %s1155_s6 = inlined_call_operand.hbm [shape: f32[16,32], index: 6, kind: output, shape index: {1}]  }
   0x1   :  { %1156 = sst [smem:[#allocation16_spill]] %s1149_s0 }
   0x2   :  { %1157 = sst [smem:[#allocation17_spill]] %s1150_s1 }
   0x3   :  { %12 = vsyncpa [#allocation4], 0 }
   0x4   :  { %14 = vsyncpa [#allocation4 + $0x1], 0 }
   0x5   :  { %15 = vsyncpa [#allocation7], 0 }
   0x6   :  { %16 = vsyncpa [#allocation5], 0 }
   0x7   :  { %18 = vsyncpa [#allocation5 + $0x1], 0 }
   0x8   :  { %19 = vsyncpa [#allocation11], 0 }
   0x9   :  { %21 = vsyncpa [#allocation11 + $0x1], 0  ;;  %s972_s21 = smov 0   ;;  %s974_s22 = smov 0  }
   0xa   :  { %s976_s23 = smov 0   ;;  %s978_s24 = smov 0  }
   0xb   :  { %s980_s25 = smov 0   ;;  %s982_s26 = smov 0  }
   0xc LB: > { %s606_s27 = sadd.s32 4294967295, %s931_s26   ;;  %s607_s28 = sadd.s32 4294967294, %s931_s26   ;;  %s931_s26 = sphi %s982_s26, %s27_s26   ;;  %s927_s25 = sphi %s980_s25, %s1169_s25   ;;  %s923_s24 = sphi %s978_s24, %s1168_s24   ;;  %s919_s23 = sphi %s976_s23, %s1167_s23   ;;  %s915_s22 = sphi %s974_s22, %s1166_s22   ;;  %s911_s21 = sphi %s972_s21, %s1165_s21  }
   0xd   : > { %p59_p0 = scmp.ne.s32.totalorder %s915_s22, %s911_s21  ;;  %p1008_p1 = scmp.eq.s32.totalorder %s606_s27, 0 }
   0xe   : > { %p185_p2 = scmp.eq.s32.totalorder %s607_s28, 1  ;;  %p608_p4 = scmp.ge.s32.totalorder %s931_s26, 1 }
   0xf   : > { %p1014_p3 = por %p1008_p1, %p59_p0  ;;  %p220_p6 = scmp.lt.s32.totalorder %s931_s26, 3 }
  0x10   : > { %p1019_p5 = por %p185_p2, %p59_p0  ;;  %s1161_s1 = sld [smem:[#allocation17_spill]] }
  0x11   : > { %p1027_p7 = pnand %p608_p4, %p220_p6  ;;  %p612_p8 = scmp.ge.s32.totalorder %s931_s26, 2 }
  0x12   : > { %s933_s12 = smov [#allocation6]   ;;  %s248_s16 = sshll.u32 %s1152_s3, 4  ;;  %s249_s16 = int_to_ptr.hbm [resolvable:$true] %s248_s16 }
  0x13   : > { %p642_p9 = pneg %p1027_p7  ;;  %s234_s13 = sshll.u32 %s933_s12, 4  ;;  %s235_s13 = int_to_ptr.vmem [resolvable:$true] %s234_s13 }
  0x14   : > { %s934_s17 = smov [#allocation8]   ;;  %s935_s19 = smov 128  }
  0x15   : > { %p643_p10 = pnand %p642_p9, %p1008_p1  ;;  %s250_s18 = sshll.u32 %s934_s17, 4  ;;  %s251_s18 = int_to_ptr.vmem [resolvable:$true] %s250_s18 }
  0x16   : > { %s232_s10 = sshll.u32 %s1161_s1, 4  ;;  %s936_s20 = smov 8   ;;  %s233_s10 = int_to_ptr.hbm [resolvable:$true] %s232_s10 }
  0x17   : > { %645 = dma.hbm_to_vmem [thread:$0]  (!%p643_p10), %s233_s10, 16, %s235_s13, [#allocation7]  }
  0x18   : > { %648 = dma.hbm_to_vmem [thread:$0]  (!%p643_p10), %s249_s16, 512, %s251_s18, [#allocation7], %s935_s19, %s935_s19, %s936_s20  }
  0x19   : > { %p179_p11 = scmp.eq.s32.totalorder %s606_s27, 1  ;;  %s39_s28 = sadd.s32 1, %s927_s25 }
  0x1a   : > { %p41_p12 = scmp.ge.s32.totalorder %s39_s28, 2  ;;  %s46_s8 = sadd.s32 1, %s919_s23 }
  0x1b   : > { %p53_p13 = scmp.ne.s32.totalorder %s919_s23, %s915_s22  ;;  %p54_p0 = scmp.eq.s32.totalorder %s931_s26, 0 }
  0x1c   : > { %s1171_s28 = smov (%p41_p12, %s39_s28), 0  ;;  %p662_p4 = scmp.lt.s32.totalorder %s931_s26, 2 }
  0x1d   : > { %p1048_p2 = por %p179_p11, %p53_p13  ;;  %s43_s10 = ssub.s32 %s927_s25, %s1171_s28 }
  0x1e   : > { %s270_s12 = sand.u32 1, %s919_s23   ;;  %p44_p6 = scmp.eq.s32.totalorder %s43_s10, 0 }
  0x1f   : > { %p55_p9 = por %p54_p0, %p53_p13  ;;  %s613_s13 = sshll.u32 %s270_s12, 3 }
  0x20   : > { %s614_s27 = sshll.u32 %s927_s25, 3  ;;  %s1164_s0 = sld [smem:[#allocation16_spill]] }
  0x21   : > { %s1058_s14 = scalar_select %p44_p6, %s919_s23, %s46_s8  }
  0x22   : > { %s274_s19 = scalar_lea.vmem [#allocation3], %s613_s13  ;;  %p650_p10 = pnand %p662_p4, %p55_p9 }
  0x23   : > { %s282_s20 = sshll.u32 %s274_s19, 4  ;;  %s271_s1 = scalar_lea.sflag [#allocation4], %s270_s12  ;;  %s283_s20 = int_to_ptr.vmem [resolvable:$true] %s282_s20 }
  0x24   : > { %291 = sbr.rel (%p1027_p7) target bundleno = 452 (0x1c4), region = 40  ;;  %s1068_s8 = sand.u32 (!%p1027_p7), 1, %s915_s22  }
  0x25   : > { %s1071_s10 = sshll.u32 (!%p1027_p7), %s1068_s8, 3  ;;  %s294_s13 = scalar_lea.sflag (!%p1027_p7), [#allocation4], %s1068_s8 }
  0x26   : > { %s278_s17 = scalar_lea.hbm %s1164_s0, %s614_s27  ;;  %s297_s27 = scalar_lea.vmem (!%p1027_p7), [#allocation3], %s1071_s10 }
  0x27   : > { %s280_s18 = sshll.u32 %s278_s17, 4  ;;  %s281_s18 = int_to_ptr.hbm [resolvable:$true] %s280_s18 }
  0x28   : > { %652 = dma.hbm_to_vmem [thread:$0]  (!%p650_p10), %s281_s18, 128, %s283_s20, %s271_s1  }
  0x29   : > { %894 = dma.done.wait (%p1014_p3), %s294_s13, 128  }
  0x2a   : > { %896 = vsyncadd (%p1014_p3), %s294_s13, 4294967168 }
  0x2b   : > { %898 = dma.done.wait (%p1008_p1), [#allocation7], 528  }
  0x2c   : > { %900 = vsyncadd (%p1008_p1), [#allocation7], 4294966768  ;;  %vm353_vm0 = vcmask 261120   ;;  %v352_v0 = vld [vmem:[%s297_s27] sm:$0xff]  ;;  %v391_v12 = vld [vmem:[#allocation8] sm:$0xff]  ;;  %s624_s30 = sshll.u32 %s923_s24, 3 }
  0x2d   : > { %v354_v1 = vsel %vm353_vm0, %v352_v0, 0.0  ;;  %v394_v7 = vld [vmem:[#allocation8 + $0x18] sm:$0xff]  ;;  %v393_v8 = vld [vmem:[#allocation8 + $0x10] sm:$0xff]  ;;  %v392_v9 = vld [vmem:[#allocation8 + $0x8] sm:$0xff]  ;;  %s344_s11 = scalar_lea.vmem [#allocation10], %s1071_s10  ;;  %s455_s16 = scalar_lea.hbm %s1155_s6, %s624_s30 }
  0x2e   : > { %355 = vadd.xlane.f32.xlu0 %v354_v1  ;;  %414 = vmatpush.msra.mxu0 %v394_v7  ;;  %v718_v20 = vld [vmem:[#allocation6] ss:$0 sm:$0xff]  ;;  %v719_v22 = vld [vmem:[%s1151_s2] ss:$0 sm:$0xff]  ;;  %389 = vst.msk [vmem:[%s344_s11] sm:$0xff] %vm353_vm0, %v352_v0  ;;  %s457_s17 = sshll.u32 %s344_s11, 4  ;;  %s458_s17 = int_to_ptr.vmem [resolvable:$true] %s457_s17 }
  0x2f   : > { %s459_s18 = sshll.u32 %s455_s16, 4  ;;  %s429_s19 = scalar_lea.sflag [#allocation11], %s1068_s8  ;;  %s460_s18 = int_to_ptr.hbm [resolvable:$true] %s459_s18 }
  0x30   : > { %415 = vmatpush.msra.mxu0 %v393_v8  ;;  %s827_s20 = sshra.s32 %s460_s18, 4  ;;  %s833_s1 = scalar_lea.hbm %s1155_s6, 16  ;;  %s828_s20 = int_to_ptr.hbm [resolvable:$true] %s827_s20 }
  0x31   : > { %s829_s13 = scalar_lea.hbm %s828_s20, 8  ;;  %p834_p11 = scmp.lt.s32.totalorder %s828_s20, %s1155_s6 }
  0x32   : > { %416 = vmatpush.msra.mxu0 %v392_v9  ;;  %p830_p1 = scmp.ne.s32.totalorder %s828_s20, %s829_s13  ;;  %p835_p12 = scmp.lt.s32.totalorder %s833_s1, %s829_s13 }
  0x34   : > { %417 = vmatpush.msra.mxu0 %v391_v12  ;;  %p831_p3 = pnand %p830_p1, %p1048_p2  ;;  %p836_p13 = por %p835_p12, %p834_p11 }
  0x36   : > { %p832_p7 = pneg %p831_p3 }
  0x38   : > { %p837_p0 = pnand %p836_p13, %p832_p7 }
  0xa1   : > { %v356_v2 = vpop.xlane.xlu0 %355 }
  0xa2   : > { %v357_v3 = vmul.f32 0.03125, %v356_v2 }
  0xa4   : > { %v358_v4 = vsub.f32 %v352_v0, %v357_v3 }
  0xa6   : > { %v359_v5 = vmul.f32 %v358_v4, %v358_v4 }
  0xa8   : > { %v360_v6 = vsel %vm353_vm0, %v359_v5, 0.0 }
  0xa9   : > { %361 = vadd.xlane.f32.xlu0 %v360_v6 }
 0x11c   : > { %v362_v10 = vpop.xlane.xlu0 %361 }
 0x11d   : > { %v363_v11 = vmul.f32 0.03125, %v362_v10 }
 0x11f   : > { %v364_v13 = vadd.f32 1e-05, %v363_v11 }
 0x121   : > { %721 = vrsqrt.f32 %v364_v13  ;;  %vm371_vm2 = vweird.f32 %v364_v13 }
 0x127   : > { %v722_v14 = vpop.eup %721 }
 0x128   : > { %v366_v15 = vmul.f32 %v722_v14, %v364_v13  ;;  %vm372_vm1 = vweird.f32 %v722_v14 }
 0x129   : > { %vm373_vm3 = vmor %vm371_vm2, %vm372_vm1 }
 0x12a   : > { %v367_v16 = vmul.f32 %v722_v14, %v366_v15 }
 0x12c   : > { %v368_v17 = vmul.f32 0.5, %v367_v16 }
 0x12e   : > { %v369_v18 = vsub.f32 1.5, %v368_v17 }
 0x130   : > { %v370_v19 = vmul.f32 %v722_v14, %v369_v18 }
 0x132   : > { %v374_v21 = vsel %vm373_vm3, %v722_v14, %v370_v19 }
 0x133   : > { %v375_v23 = vmul.f32 %v374_v21, %v358_v4 }
 0x135   : > { %v380_v24 = vmul.f32 %v718_v20, %v375_v23 }
 0x137   : > { %v385_v25 = vadd.f32 %v719_v22, %v380_v24 }
 0x139   : > { %386 = vst.msk [vmem:[#allocation2] sm:$0xff] %vm353_vm0, %v385_v25 }
 0x140   : > { %v390_v26 = vld [vmem:[#allocation2] sm:$0xff] }
 0x141   : > { %621 = vmatmul.msk.f32.vlgmr.msra.gmra.mxu0 %vm353_vm0, %v390_v26 }
 0x142   : > { %840 = shalt.err (!%p837_p0)
}
 0x143   : > { %639 = dma.vmem_to_hbm [thread:$0]  (%p1048_p2), %s458_s17, 128, %s460_s18, %s429_s19   ;;  %v720_v27 = vld [vmem:[%s1153_s4] ss:$0 sm:$0xff] }
 0x144   : > { %s440_s15 = scalar_lea.hbm %s1154_s5, %s624_s30  ;;  %s337_s0 = scalar_lea.vmem [#allocation9], %s1071_s10 }
 0x145   : > { %s442_s20 = sshll.u32 %s337_s0, 4  ;;  %s444_s13 = sshll.u32 %s440_s15, 4  ;;  %s443_s20 = int_to_ptr.vmem [resolvable:$true] %s442_s20  ;;  %s445_s13 = int_to_ptr.hbm [resolvable:$true] %s444_s13 }
 0x146   : > { %s424_s27 = scalar_lea.sflag [#allocation5], %s1068_s8  ;;  %s855_s17 = sshra.s32 %s445_s13, 4  ;;  %s856_s17 = int_to_ptr.hbm [resolvable:$true] %s855_s17 }
 0x147   : > { %s857_s18 = scalar_lea.hbm %s856_s17, 8  ;;  %s861_s10 = scalar_lea.hbm %s1154_s5, 16 }
 0x148   : > { %p858_p4 = scmp.ne.s32.totalorder %s856_s17, %s857_s18  ;;  %p862_p10 = scmp.lt.s32.totalorder %s856_s17, %s1154_s5 }
 0x149   : > { %p863_p1 = scmp.lt.s32.totalorder %s861_s10, %s857_s18 }
 0x14a   : > { %p859_p6 = pnand %p858_p4, %p1048_p2 }
 0x14b   : > { %p864_p3 = por %p863_p1, %p862_p10 }
 0x14c   : > { %p860_p9 = pneg %p859_p6 }
 0x14e   : > { %p865_p7 = pnand %p864_p3, %p860_p9 }
 0x1be   : > { %v419_v28 = vpop.f32.mrf.mxu0 }
 0x1bf   : > { %v420_v29 = vadd.f32 %v720_v27, %v419_v28 }
 0x1c1   : > { %422 = vst.msk [vmem:[%s337_s0] sm:$0xff] %vm353_vm0, %v420_v29 }
 0x1c2   : > { %868 = shalt.err (!%p865_p7)
}
 0x1c3   : > { %638 = dma.vmem_to_hbm [thread:$0]  (%p1048_p2), %s443_s20, 128, %s445_s13, %s424_s27  }
 0x1c4 PF: > { %s471_s8 = sand.u32 1, %s911_s21   ;;  %p654_p11 = pnand %p612_p8, %p1019_p5 }
 0x1c5   : > { %s472_s11 = scalar_lea.sflag [#allocation5], %s471_s8 }
 0x1c6   : > { %p655_p12 = pneg %p654_p11 }
 0x1c8   : > { %902 = dma.done.wait (%p655_p12), %s472_s11, 128  }
 0x1c9   : > { %904 = vsyncadd (%p655_p12), %s472_s11, 4294967168  ;;  %s482_s12 = scalar_lea.sflag [#allocation11], %s471_s8 }
 0x1ca   : > { %906 = dma.done.wait (%p655_p12), %s482_s12, 128  }
 0x1cb   : > { %908 = vsyncadd (%p655_p12), %s482_s12, 4294967168  ;;  %s27_s26 = sadd.s32 1, %s931_s26   ;;  %s1165_s21 = smov %s915_s22 }
 0x1cc   : > { %p24_p13 = scmp.ge.s32.totalorder %s27_s26, 4   ;;  %s1166_s22 = smov %s919_s23 }
 0x1cd   : > { %s1167_s23 = smov %s1058_s14  ;;  %s1168_s24 = smov %s927_s25 }
 0x1ce   : > { %s1169_s25 = smov %s1171_s28  ;;  %26 = sbr.rel (!%p24_p13) target bundleno = 12 (0xc), region = 118 }
 0x1d3   :  { %488 = vsyncpa [#allocation4], 1 }
 0x1d4   :  { %490 = vsyncpa [#allocation4 + $0x1], 1 }
 0x1d5   :  { %491 = vsyncpa [#allocation7], 1 }
 0x1d6   :  { %492 = vsyncpa [#allocation5], 1 }
 0x1d7   :  { %494 = vsyncpa [#allocation5 + $0x1], 1 }
 0x1d8   :  { %495 = vsyncpa [#allocation11], 1 }
 0x1d9   :  { %497 = vsyncpa [#allocation11 + $0x1], 1 }

</bundles_post_ra>
